<compile_context>
chip_gen: v7x
topology: tpu7x:2x2x1
jax: 0.10.0
libtpu: 0.0.40
codegen_flags: <defaults>
</compile_context>

<pallas_src>
import math

import jax
import jax.numpy as jnp
from jax.experimental import pallas as pl
from jax.experimental.pallas import tpu as pltpu

HID = 256        # hidden width of both inner Linear layers
TM_MAX = 1024    # batch-tile cap


def _cdiv(a, b):
    return (a + b - 1) // b


def _round_up(n, m):
    return ((n + m - 1) // m) * m


def _sigmoid(x):
    # exp -> EUP, approximate reciprocal -> EUP; avoids a VPU divide.
    return pl.reciprocal(1.0 + jnp.exp(-x), approx=True)


def mlp_decoder_kernel(x_ref, w1_ref, b1_ref, w2_ref, b2_ref, w3_ref, b3_ref, o_ref):
    # Fused 3-layer MLP on one batch tile: bf16 MXU matmuls with f32
    # accumulation; bias add + sigmoid stay in f32.
    x = x_ref[...]  # (TM, in_dim) bf16
    h1 = jnp.dot(x, w1_ref[...], preferred_element_type=jnp.float32) + b1_ref[...]
    h1 = _sigmoid(h1)
    h2 = (jnp.dot(h1.astype(jnp.bfloat16), w2_ref[...],
                  preferred_element_type=jnp.float32) + b2_ref[...])
    h2 = _sigmoid(h2)
    out = (jnp.dot(h2.astype(jnp.bfloat16), w3_ref[...],
                   preferred_element_type=jnp.float32) + b3_ref[...])
    o_ref[...] = out.astype(o_ref.dtype)


def prepare_params(params, num_atoms, zdim):
    """One-time bf16 cast + lane-dense padding of the weights.

    Hoisted out of the forward so no per-call weight re-materialization.
    W1 is NOT K-padded: the MXU handles K < 128 internally at no extra cost.
    """
    del zdim  # in_dim implied by w1's shape
    out_dim = num_atoms * num_atoms
    n_pad = _round_up(out_dim, 128)  # lane-dense output width (unmasked vst)
    w1, b1, w2, b2, w3, b3 = params
    w1_b = w1.astype(jnp.bfloat16)                                   # (in_dim, 256)
    w2_b = w2.astype(jnp.bfloat16)                                   # (256, 256)
    w3_p = jnp.zeros((HID, n_pad), jnp.bfloat16).at[:, :out_dim].set(
        w3.astype(jnp.bfloat16))                                     # (256, n_pad)
    b3_p = jnp.zeros((1, n_pad), jnp.float32).at[:, :out_dim].set(b3)
    return (w1_b, b1, w2_b, b2, w3_p, b3_p)


def _tile_plan(B):
    """Pick (TM, b_pad, num_tiles).

    * TM capped at TM_MAX so per-step overhead is amortized,
    * batch-padding waste bounded below one tile,
    * >=2 grid steps when B > 16 so the "parallel" batch axis shards across
      v7x's two TensorCores,
    * TM rounded to 16 (native bf16 sublane tile).
    """
    num_tiles = _cdiv(B, TM_MAX)
    if num_tiles < 2 and B > 16:
        num_tiles = 2
    TM = _round_up(_cdiv(B, num_tiles), 16)
    b_pad = TM * num_tiles
    return TM, b_pad, num_tiles


def mlp_decoder_forward(x, prepared_params, num_atoms, zdim):
    """x: (B, num_atoms, zdim) float32 -> (B, num_atoms, num_atoms) float32."""
    B = x.shape[0]
    in_dim = num_atoms * zdim
    out_dim = num_atoms * num_atoms

    w1_b, b1, w2_b, b2, w3_p, b3_p = prepared_params
    n_pad = w3_p.shape[1]

    TM, b_pad, num_tiles = _tile_plan(B)
    grid = (num_tiles,)

    # Only per-call wrapper work: reshape, bf16 cast, and (if needed) a small
    # batch pad of the (B, in_dim) activations.
    x2d = jnp.reshape(x, (B, in_dim)).astype(jnp.bfloat16)
    if b_pad != B:
        x_p = jnp.zeros((b_pad, in_dim), jnp.bfloat16).at[:B, :].set(x2d)
    else:
        x_p = x2d

    # Weights/biases stay VMEM-resident across the whole grid.
    resident = lambda shape: pl.BlockSpec(shape, lambda i: (0, 0))

    out_padded = pl.pallas_call(
        mlp_decoder_kernel,
        out_shape=jax.ShapeDtypeStruct((b_pad, n_pad), jnp.float32),
        grid_spec=pltpu.PrefetchScalarGridSpec(
            num_scalar_prefetch=0,
            grid=grid,
            in_specs=[
                pl.BlockSpec((TM, in_dim), lambda i: (i, 0)),   # x tile (no K pad)
                resident((in_dim, HID)), resident((1, HID)),    # W1, b1
                resident((HID, HID)),    resident((1, HID)),    # W2, b2
                resident((HID, n_pad)),  resident((1, n_pad)),  # W3, b3
            ],
            out_specs=pl.BlockSpec((TM, n_pad), lambda i: (i, 0)),
        ),
        compiler_params=pltpu.CompilerParams(
            dimension_semantics=("parallel",)),
    )(x_p, w1_b, b1, w2_b, b2, w3_p, b3_p)

    out2d = out_padded[:B, :out_dim]
    return jnp.reshape(out2d, (B, num_atoms, num_atoms))


def init_params(key, num_atoms, zdim):
    """Deterministic init matching nn.Linear's default U(-1/sqrt(fan_in), 1/sqrt(fan_in)).
    Weights stored as (in_features, out_features)."""
    in_dim = num_atoms * zdim
    out_dim = num_atoms * num_atoms
    dims = [(in_dim, HID), (HID, HID), (HID, out_dim)]
    params = []
    for (fan_in, fan_out) in dims:
        key, kw, kb = jax.random.split(key, 3)
        bound = 1.0 / math.sqrt(fan_in)
        w = jax.random.uniform(kw, (fan_in, fan_out), jnp.float32, -bound, bound)
        b = jax.random.uniform(kb, (1, fan_out), jnp.float32, -bound, bound)
        params += [w, b]
    return tuple(params)


if __name__ == "__main__":
    num_atoms = 8
    zdim = 4
    batch = 2

    key = jax.random.PRNGKey(0)
    key, kx = jax.random.split(key)
    x = jax.random.normal(kx, (batch, num_atoms, zdim), jnp.float32)

    params = init_params(key, num_atoms, zdim)
    prepared = prepare_params(params, num_atoms, zdim)   # one-time, hoisted

    fwd = jax.jit(mlp_decoder_forward, static_argnums=(2, 3))
    out = fwd(x, prepared, num_atoms, zdim)
    out = jax.block_until_ready(out)

    # Sanity-check against a pure-JAX f32 reference of the same math.
    # bf16 matmul operands (f32 accumulation) + approx reciprocal in sigmoid
    # -> loose tolerance vs. the f32 reference.
    w1, b1, w2, b2, w3, b3 = params
    x2d = x.reshape(batch, num_atoms * zdim)
    ref = jax.nn.sigmoid(x2d @ w1 + b1)
    ref = jax.nn.sigmoid(ref @ w2 + b2)
    ref = (ref @ w3 + b3).reshape(batch, num_atoms, num_atoms)
    assert out.shape == (batch, num_atoms, num_atoms)
    assert jnp.allclose(out, ref, atol=5e-2, rtol=5e-2)

    print("KERNEL_OK")
</pallas_src>

<mosaic_0001>
module attributes {stable_mosaic.version = 11 : i64} {
  func.func @mlp_decoder_kernel(%arg0: i32, %arg1: memref<16x32xbf16, #tpu.memory_space<vmem>>, %arg2: memref<32x256xbf16, #tpu.memory_space<vmem>>, %arg3: memref<1x256xf32, #tpu.memory_space<vmem>>, %arg4: memref<256x256xbf16, #tpu.memory_space<vmem>>, %arg5: memref<1x256xf32, #tpu.memory_space<vmem>>, %arg6: memref<256x128xbf16, #tpu.memory_space<vmem>>, %arg7: memref<1x128xf32, #tpu.memory_space<vmem>>, %arg8: memref<16x128xf32, #tpu.memory_space<vmem>>) attributes {dimension_semantics = [#tpu.dimension_semantics<parallel>], iteration_bounds = array<i64: 1>, scalar_prefetch = 0 : i64, scratch_operands = 0 : i64, tpu.core_type = #tpu.core_type<tc>, window_params = [{transform_indices = @transform_0, window_bounds = array<i64: 16, 32>}, {pipeline_mode = #tpu.pipeline_mode<synchronous>, transform_indices = @transform_1, window_bounds = array<i64: 32, 256>}, {pipeline_mode = #tpu.pipeline_mode<synchronous>, transform_indices = @transform_2, window_bounds = array<i64: 1, 256>}, {pipeline_mode = #tpu.pipeline_mode<synchronous>, transform_indices = @transform_3, window_bounds = array<i64: 256, 256>}, {pipeline_mode = #tpu.pipeline_mode<synchronous>, transform_indices = @transform_4, window_bounds = array<i64: 1, 256>}, {pipeline_mode = #tpu.pipeline_mode<synchronous>, transform_indices = @transform_5, window_bounds = array<i64: 256, 128>}, {pipeline_mode = #tpu.pipeline_mode<synchronous>, transform_indices = @transform_6, window_bounds = array<i64: 1, 128>}, {transform_indices = @transform_7, window_bounds = array<i64: 16, 128>}]} {
    %c0 = arith.constant 0 : index
    %c0_0 = arith.constant 0 : index
    %0 = vector.load %arg1[%c0, %c0_0] : memref<16x32xbf16, #tpu.memory_space<vmem>>, vector<16x32xbf16>
    %c0_1 = arith.constant 0 : index
    %c0_2 = arith.constant 0 : index
    %1 = vector.load %arg2[%c0_1, %c0_2] : memref<32x256xbf16, #tpu.memory_space<vmem>>, vector<32x256xbf16>
    %cst = arith.constant dense<0.000000e+00> : vector<16x256xf32>
    %2 = tpu.matmul %0, %1, %cst {dimension_numbers = #tpu.dot_dimension_numbers<[1], [0], [0], [1], [0, 0, 1, 1], [], []>} : vector<16x32xbf16>, vector<32x256xbf16>, vector<16x256xf32> -> vector<16x256xf32>
    %c0_3 = arith.constant 0 : index
    %c0_4 = arith.constant 0 : index
    %3 = vector.load %arg3[%c0_3, %c0_4] : memref<1x256xf32, #tpu.memory_space<vmem>>, vector<1x256xf32>
    %4 = vector.broadcast %3 : vector<1x256xf32> to vector<16x256xf32>
    %5 = arith.addf %2, %4 : vector<16x256xf32>
    %cst_5 = arith.constant 0.000000e+00 : f32
    %6 = vector.broadcast %cst_5 : f32 to vector<16x256xf32>
    %7 = arith.subf %6, %5 : vector<16x256xf32>
    %8 = math.exp %7 : vector<16x256xf32>
    %cst_6 = arith.constant 1.000000e+00 : f32
    %9 = vector.broadcast %cst_6 : f32 to vector<16x256xf32>
    %10 = arith.addf %9, %8 : vector<16x256xf32>
    %11 = tpu.reciprocal %10 {approx = true} : vector<16x256xf32> -> vector<16x256xf32>
    %12 = arith.truncf %11 : vector<16x256xf32> to vector<16x256xbf16>
    %c0_7 = arith.constant 0 : index
    %c0_8 = arith.constant 0 : index
    %13 = vector.load %arg4[%c0_7, %c0_8] : memref<256x256xbf16, #tpu.memory_space<vmem>>, vector<256x256xbf16>
    %cst_9 = arith.constant dense<0.000000e+00> : vector<16x256xf32>
    %14 = tpu.matmul %12, %13, %cst_9 {dimension_numbers = #tpu.dot_dimension_numbers<[1], [0], [0], [1], [0, 0, 1, 1], [], []>} : vector<16x256xbf16>, vector<256x256xbf16>, vector<16x256xf32> -> vector<16x256xf32>
    %c0_10 = arith.constant 0 : index
    %c0_11 = arith.constant 0 : index
    %15 = vector.load %arg5[%c0_10, %c0_11] : memref<1x256xf32, #tpu.memory_space<vmem>>, vector<1x256xf32>
    %16 = vector.broadcast %15 : vector<1x256xf32> to vector<16x256xf32>
    %17 = arith.addf %14, %16 : vector<16x256xf32>
    %cst_12 = arith.constant 0.000000e+00 : f32
    %18 = vector.broadcast %cst_12 : f32 to vector<16x256xf32>
    %19 = arith.subf %18, %17 : vector<16x256xf32>
    %20 = math.exp %19 : vector<16x256xf32>
    %cst_13 = arith.constant 1.000000e+00 : f32
    %21 = vector.broadcast %cst_13 : f32 to vector<16x256xf32>
    %22 = arith.addf %21, %20 : vector<16x256xf32>
    %23 = tpu.reciprocal %22 {approx = true} : vector<16x256xf32> -> vector<16x256xf32>
    %24 = arith.truncf %23 : vector<16x256xf32> to vector<16x256xbf16>
    %c0_14 = arith.constant 0 : index
    %c0_15 = arith.constant 0 : index
    %25 = vector.load %arg6[%c0_14, %c0_15] : memref<256x128xbf16, #tpu.memory_space<vmem>>, vector<256x128xbf16>
    %cst_16 = arith.constant dense<0.000000e+00> : vector<16x128xf32>
    %26 = tpu.matmul %24, %25, %cst_16 {dimension_numbers = #tpu.dot_dimension_numbers<[1], [0], [0], [1], [0, 0, 1, 1], [], []>} : vector<16x256xbf16>, vector<256x128xbf16>, vector<16x128xf32> -> vector<16x128xf32>
    %c0_17 = arith.constant 0 : index
    %c0_18 = arith.constant 0 : index
    %27 = vector.load %arg7[%c0_17, %c0_18] : memref<1x128xf32, #tpu.memory_space<vmem>>, vector<1x128xf32>
    %28 = vector.broadcast %27 : vector<1x128xf32> to vector<16x128xf32>
    %29 = arith.addf %26, %28 : vector<16x128xf32>
    %c0_19 = arith.constant 0 : index
    %c0_20 = arith.constant 0 : index
    %30 = vector.load %arg8[%c0_19, %c0_20] : memref<16x128xf32, #tpu.memory_space<vmem>>, vector<16x128xf32>
    tpu.vector_store %arg8[%c0_19, %c0_20], %29 {strides = array<i32>} : memref<16x128xf32, #tpu.memory_space<vmem>>, vector<16x128xf32>,
    return
  }
  func.func @transform_0(%arg0: i32) -> (i32, i32) {
    %c0_i32 = arith.constant 0 : i32
    %c0_i32_0 = arith.constant 0 : i32
    return %arg0, %c0_i32 : i32, i32
  }
  func.func @transform_1(%arg0: i32) -> (i32, i32) {
    %c0_i32 = arith.constant 0 : i32
    %c0_i32_0 = arith.constant 0 : i32
    %c0_i32_1 = arith.constant 0 : i32
    return %c0_i32, %c0_i32_0 : i32, i32
  }
  func.func @transform_2(%arg0: i32) -> (i32, i32) {
    %c0_i32 = arith.constant 0 : i32
    %c0_i32_0 = arith.constant 0 : i32
    %c0_i32_1 = arith.constant 0 : i32
    return %c0_i32, %c0_i32_0 : i32, i32
  }
  func.func @transform_3(%arg0: i32) -> (i32, i32) {
    %c0_i32 = arith.constant 0 : i32
    %c0_i32_0 = arith.constant 0 : i32
    %c0_i32_1 = arith.constant 0 : i32
    return %c0_i32, %c0_i32_0 : i32, i32
  }
  func.func @transform_4(%arg0: i32) -> (i32, i32) {
    %c0_i32 = arith.constant 0 : i32
    %c0_i32_0 = arith.constant 0 : i32
    %c0_i32_1 = arith.constant 0 : i32
    return %c0_i32, %c0_i32_0 : i32, i32
  }
  func.func @transform_5(%arg0: i32) -> (i32, i32) {
    %c0_i32 = arith.constant 0 : i32
    %c0_i32_0 = arith.constant 0 : i32
    %c0_i32_1 = arith.constant 0 : i32
    return %c0_i32, %c0_i32_0 : i32, i32
  }
  func.func @transform_6(%arg0: i32) -> (i32, i32) {
    %c0_i32 = arith.constant 0 : i32
    %c0_i32_0 = arith.constant 0 : i32
    %c0_i32_1 = arith.constant 0 : i32
    return %c0_i32, %c0_i32_0 : i32, i32
  }
  func.func @transform_7(%arg0: i32) -> (i32, i32) {
    %c0_i32 = arith.constant 0 : i32
    %c0_i32_0 = arith.constant 0 : i32
    return %arg0, %c0_i32 : i32, i32
  }
}

</mosaic_0001>

<bundles_post_ra>
// kernel: mlp_decoder_forward.1
= control target key start
LH: loop header
LB: loop body
LE: loop exit
PB: predicated region body
PF: predicated region fallthrough
CT: control target
= control target key end

     0   :  { %12 = vsyncpa [#allocation3], 0  ;;  %s968_s0 = inlined_call_operand.vmem [shape: bf16[16,32], index: 0, kind: input, shape index: {}]   ;;  %s969_s1 = inlined_call_operand.vmem [shape: bf16[32,256], index: 1, kind: input, shape index: {}]   ;;  %s970_s2 = inlined_call_operand.vmem [shape: f32[1,256], index: 2, kind: input, shape index: {}]   ;;  %s971_s3 = inlined_call_operand.hbm [shape: bf16[256,256], index: 3, kind: input, shape index: {}]   ;;  %s972_s4 = inlined_call_operand.vmem [shape: f32[1,256], index: 4, kind: input, shape index: {}]   ;;  %s973_s5 = inlined_call_operand.hbm [shape: bf16[256,128], index: 5, kind: input, shape index: {}]   ;;  %s974_s6 = inlined_call_operand.vmem [shape: f32[1,128], index: 6, kind: input, shape index: {}]   ;;  %s975_s7 = inlined_call_operand.vmem [shape: f32[16,128], index: 7, kind: output, shape index: {}]  }
   0x1   :  { %13 = vsyncpa [#allocation5], 0  ;;  %s855_s24 = smov [#allocation2]   ;;  %s807_s28 = scalar_lea.hbm %s971_s3, 4096 }
   0x2   :  { %s25_s25 = sshll.u32 %s855_s24, 4  ;;  %p808_p0 = scmp.ne.s32.totalorder %s971_s3, %s807_s28  ;;  %s26_s25 = int_to_ptr.vmem [resolvable:$true] %s25_s25 }
   0x3   :  { %p811_p1 = scmp.lt.u32.totalorder %s807_s28, %s971_s3 }
   0x5   :  { %p813_p2 = pnand %p811_p1, %p808_p0 }
   0x7   :  { %816 = shalt.err (!%p813_p2)
}
   0x8   :  { %s817_s10 = scalar_lea.vmem %s26_s25, 4096  ;;  %p822_p4 = scmp.lt.s32.totalorder %s26_s25, %s26_s25 }
   0x9   :  { %p818_p3 = scmp.ne.s32.totalorder %s26_s25, %s817_s10  ;;  %p823_p5 = scmp.lt.s32.totalorder %s817_s10, %s817_s10 }
   0xb   :  { %p824_p6 = por %p823_p5, %p822_p4 }
   0xd   :  { %p825_p7 = pnand %p824_p6, %p818_p3 }
   0xf   :  { %828 = shalt.err (!%p825_p7)
}
  0x10   :  { %s856_s11 = smov 128   ;;  %s857_s12 = smov 8  }
  0x11   :  { %31 = dma.hbm_to_vmem [thread:$0]  %s971_s3, 4096, %s26_s25, [#allocation3], %s856_s11, %s856_s11, %s857_s12  }
  0x12   :  { %s858_s15 = smov [#allocation4]   ;;  %s829_s19 = scalar_lea.hbm %s973_s5, 2048 }
  0x13   :  { %s39_s16 = sshll.u32 %s858_s15, 4  ;;  %p830_p8 = scmp.ne.s32.totalorder %s973_s5, %s829_s19  ;;  %s40_s16 = int_to_ptr.vmem [resolvable:$true] %s39_s16 }
  0x14   :  { %p833_p9 = scmp.lt.u32.totalorder %s829_s19, %s973_s5 }
  0x16   :  { %p835_p10 = pnand %p833_p9, %p830_p8 }
  0x18   :  { %838 = shalt.err (!%p835_p10)
}
  0x19   :  { %s839_s24 = scalar_lea.vmem %s40_s16, 2048  ;;  %p844_p12 = scmp.lt.s32.totalorder %s40_s16, %s40_s16 }
  0x1a   :  { %p840_p11 = scmp.ne.s32.totalorder %s40_s16, %s839_s24  ;;  %p845_p13 = scmp.lt.s32.totalorder %s839_s24, %s839_s24 }
  0x1c   :  { %p846_p0 = por %p845_p13, %p844_p12 }
  0x1e   :  { %p847_p1 = pnand %p846_p0, %p840_p11 }
  0x20   :  { %850 = shalt.err (!%p847_p1)
}
  0x21   :  { %s859_s3 = smov 64   ;;  %s860_s25 = smov 4  }
  0x22   :  { %45 = dma.hbm_to_vmem [thread:$0]  %s973_s5, 2048, %s40_s16, [#allocation5], %s859_s3, %s859_s3, %s860_s25  }
  0x23   :  { %851 = dma.done.wait [#allocation3], 4096  }
  0x24   :  { %852 = vsyncadd [#allocation3], 4294963200 }
  0x25   :  { %853 = dma.done.wait [#allocation5], 2048  }
  0x26   :  { %854 = vsyncadd [#allocation5], 4294965248  ;;  %v861_v0 = vmov 0   ;;  %v704_v1 = vld [vmem:[%s969_s1 + $0x4] ss:$8 sps:$4 sm:$0xff]   ;;  %vm98_vm0 = vcmask 261120   ;;  %v63_v38 = vlaneseq }
  0x27   :  { %134 = vmatprep.mubr.bf16.mxu0 %v861_v0  ;;  %v706_v2 = vld [vmem:[%s969_s1] ss:$8 sps:$4 sm:$0xff]   ;;  %102 = vmatprep.subr.bf16.mxu0 %v704_v1  ;;  %v707_v3 = vld [vmem:[%s969_s1 + $0x14] ss:$8 sps:$4 sm:$0xff]   ;;  %v709_v4 = vld [vmem:[%s969_s1 + $0x10] ss:$8 sps:$4 sm:$0xff]  }
  0x28   :  { %103 = vmatpush1.bf16.msra.mxu0 %v706_v2  ;;  %v711_v5 = vld [vmem:[#allocation2 + $0x4] ss:$8 sps:$4 sm:$0xff]   ;;  %v713_v6 = vld [vmem:[#allocation2] ss:$8 sps:$4 sm:$0xff]   ;;  %v714_v7 = vld [vmem:[#allocation2 + $0x14] ss:$8 sps:$4 sm:$0xff]  }
  0x29   :  { %104 = vmatprep.subr.bf16.mxu0 %v707_v3  ;;  %v710_v8 = vld [vmem:[%s968_s0] sm:$0xff]   ;;  %371 = vmatprep.subr.bf16.mxu1 %v711_v5  ;;  %v716_v9 = vld [vmem:[#allocation2 + $0x10] ss:$8 sps:$4 sm:$0xff]   ;;  %v720_v12 = vld [vmem:[#allocation2 + $0x34] ss:$8 sps:$4 sm:$0xff]   ;;  %v941_v39 = vshrl.u32 %v63_v38, 7 }
  0x2a   :  { %372 = vmatpush1.bf16.msra.mxu1 %v713_v6  ;;  %v717_v10 = vld [vmem:[#allocation2 + $0x24] ss:$8 sps:$4 sm:$0xff]   ;;  %v719_v11 = vld [vmem:[#allocation2 + $0x20] ss:$8 sps:$4 sm:$0xff]   ;;  %v722_v13 = vld [vmem:[#allocation2 + $0x30] ss:$8 sps:$4 sm:$0xff]  }
  0x2b   :  { %373 = vmatprep.subr.bf16.mxu1 %v714_v7  ;;  %v723_v14 = vld [vmem:[#allocation2 + $0x44] ss:$8 sps:$4 sm:$0xff]   ;;  %v725_v15 = vld [vmem:[#allocation2 + $0x40] ss:$8 sps:$4 sm:$0xff]   ;;  %v726_v16 = vld [vmem:[#allocation2 + $0x54] ss:$8 sps:$4 sm:$0xff]  }
  0x2c   :  { %105 = vmatpush1.bf16.msra.mxu0 %v709_v4  ;;  %v728_v17 = vld [vmem:[#allocation2 + $0x50] ss:$8 sps:$4 sm:$0xff]   ;;  %v729_v18 = vld [vmem:[#allocation2 + $0x64] ss:$8 sps:$4 sm:$0xff]   ;;  %v731_v19 = vld [vmem:[#allocation2 + $0x60] ss:$8 sps:$4 sm:$0xff]  }
  0x2d   :  { %v732_v20 = vld [vmem:[#allocation2 + $0x74] ss:$8 sps:$4 sm:$0xff]   ;;  %v734_v21 = vld [vmem:[#allocation2 + $0x70] ss:$8 sps:$4 sm:$0xff]   ;;  %v735_v22 = vld [vmem:[#allocation2 + $0x84] ss:$8 sps:$4 sm:$0xff]  }
  0x2e   :  { %374 = vmatpush1.bf16.msra.mxu1 %v716_v9  ;;  %v737_v23 = vld [vmem:[#allocation2 + $0x80] ss:$8 sps:$4 sm:$0xff]   ;;  %v738_v24 = vld [vmem:[#allocation2 + $0x94] ss:$8 sps:$4 sm:$0xff]   ;;  %v740_v25 = vld [vmem:[#allocation2 + $0x90] ss:$8 sps:$4 sm:$0xff]  }
  0x2f   :  { %625 = vmatmul.mubr.msk.bf16.vlgmr.msra.gmra.mrb[0].mxu0 %vm98_vm0, %v710_v8  ;;  %375 = vmatprep.subr.bf16.mxu1 %v717_v10  ;;  %v741_v26 = vld [vmem:[#allocation2 + $0xa4] ss:$8 sps:$4 sm:$0xff]   ;;  %v743_v27 = vld [vmem:[#allocation2 + $0xa0] ss:$8 sps:$4 sm:$0xff]   ;;  %v744_v28 = vld [vmem:[#allocation2 + $0xb4] ss:$8 sps:$4 sm:$0xff]  }
  0x30   :  { %v746_v29 = vld [vmem:[#allocation2 + $0xb0] ss:$8 sps:$4 sm:$0xff]   ;;  %v747_v30 = vld [vmem:[#allocation2 + $0xc4] ss:$8 sps:$4 sm:$0xff]   ;;  %v749_v31 = vld [vmem:[#allocation2 + $0xc0] ss:$8 sps:$4 sm:$0xff]  }
  0x31   :  { %v750_v32 = vld [vmem:[#allocation2 + $0xd4] ss:$8 sps:$4 sm:$0xff]   ;;  %v752_v33 = vld [vmem:[#allocation2 + $0xd0] ss:$8 sps:$4 sm:$0xff]   ;;  %v753_v34 = vld [vmem:[#allocation2 + $0xe4] ss:$8 sps:$4 sm:$0xff]  }
  0x32   :  { %376 = vmatpush1.bf16.msra.mxu1 %v719_v11  ;;  %v755_v35 = vld [vmem:[#allocation2 + $0xe0] ss:$8 sps:$4 sm:$0xff]   ;;  %v756_v36 = vld [vmem:[#allocation2 + $0xf4] ss:$8 sps:$4 sm:$0xff]   ;;  %v758_v37 = vld [vmem:[#allocation2 + $0xf0] ss:$8 sps:$4 sm:$0xff]  }
  0x33   :  { %377 = vmatprep.subr.bf16.mxu1 %v720_v12  ;;  %v65_v40 = vsub.s32 0, %v941_v39  ;;  %v61_v41 = vld [vmem:[%s970_s2] sm:$0x3]  ;;  %v69_v42 = vsub.s32 1, %v941_v39 }
  0x34   :  { %v759_v11 = vld [vmem:[#allocation4 + $0x40] sm:$0xff]  }
  0x35   :  { %v66_v43 = vrot.slane %v61_v41, %v65_v40  ;;  %v70_v44 = vrot.slane %v61_v41, %v69_v42  ;;  %v760_v12 = vld [vmem:[#allocation4] sm:$0xff]   ;;  %675 = vmatprep.subr.bf16.mxu0 %v759_v11 }
  0x36   :  { %378 = vmatpush1.bf16.msra.mxu1 %v722_v13  ;;  %676 = vmatpush3.bf16.msra.mxu0 %v760_v12  ;;  %v761_v13 = vld [vmem:[#allocation4 + $0x48] sm:$0xff]  }
  0x37   :  { %379 = vmatprep.subr.bf16.mxu1 %v723_v14  ;;  %v762_v14 = vld [vmem:[#allocation4 + $0x8] sm:$0xff]   ;;  %677 = vmatprep.subr.bf16.mxu0 %v761_v13 }
  0x3a   :  { %380 = vmatpush1.bf16.msra.mxu1 %v725_v15  ;;  %678 = vmatpush3.bf16.msra.mxu0 %v762_v14  ;;  %v763_v15 = vld [vmem:[#allocation4 + $0x50] sm:$0xff]  }
  0x3b   :  { %381 = vmatprep.subr.bf16.mxu1 %v726_v16  ;;  %v764_v16 = vld [vmem:[#allocation4 + $0x10] sm:$0xff]   ;;  %679 = vmatprep.subr.bf16.mxu0 %v763_v15 }
  0x3e   :  { %382 = vmatpush1.bf16.msra.mxu1 %v728_v17  ;;  %680 = vmatpush3.bf16.msra.mxu0 %v764_v16  ;;  %v765_v17 = vld [vmem:[#allocation4 + $0x58] sm:$0xff]  }
  0x3f   :  { %383 = vmatprep.subr.bf16.mxu1 %v729_v18  ;;  %v766_v18 = vld [vmem:[#allocation4 + $0x18] sm:$0xff]   ;;  %681 = vmatprep.subr.bf16.mxu0 %v765_v17 }
  0x42   :  { %384 = vmatpush1.bf16.msra.mxu1 %v731_v19  ;;  %682 = vmatpush3.bf16.msra.mxu0 %v766_v18  ;;  %v767_v19 = vld [vmem:[#allocation4 + $0x60] sm:$0xff]  }
  0x43   :  { %385 = vmatprep.subr.bf16.mxu1 %v732_v20  ;;  %v768_v20 = vld [vmem:[#allocation4 + $0x20] sm:$0xff]   ;;  %683 = vmatprep.subr.bf16.mxu0 %v767_v19 }
  0x46   :  { %386 = vmatpush1.bf16.msra.mxu1 %v734_v21  ;;  %684 = vmatpush3.bf16.msra.mxu0 %v768_v20  ;;  %v769_v21 = vld [vmem:[#allocation4 + $0x68] sm:$0xff]  }
  0x47   :  { %387 = vmatprep.subr.bf16.mxu1 %v735_v22  ;;  %v770_v22 = vld [vmem:[#allocation4 + $0x28] sm:$0xff]   ;;  %685 = vmatprep.subr.bf16.mxu0 %v769_v21 }
  0x4a   :  { %388 = vmatpush1.bf16.msra.mxu1 %v737_v23  ;;  %v771_v23 = vld [vmem:[#allocation4 + $0x70] sm:$0xff]   ;;  %686 = vmatpush3.bf16.msra.mxu0 %v770_v22 }
  0x4b   :  { %389 = vmatprep.subr.bf16.mxu1 %v738_v24  ;;  %v772_v24 = vld [vmem:[#allocation4 + $0x30] sm:$0xff]   ;;  %687 = vmatprep.subr.bf16.mxu0 %v771_v23 }
  0x4e   :  { %390 = vmatpush1.bf16.msra.mxu1 %v740_v25  ;;  %v773_v25 = vld [vmem:[#allocation4 + $0x78] sm:$0xff]   ;;  %688 = vmatpush3.bf16.msra.mxu0 %v772_v24 }
  0x4f   :  { %391 = vmatprep.subr.bf16.mxu1 %v741_v26  ;;  %v774_v26 = vld [vmem:[#allocation4 + $0x38] sm:$0xff]   ;;  %689 = vmatprep.subr.bf16.mxu0 %v773_v25 }
  0x52   :  { %392 = vmatpush1.bf16.msra.mxu1 %v743_v27  ;;  %690 = vmatpush3.bf16.msra.mxu0 %v774_v26  ;;  %v199_v27 = vld [vmem:[%s972_s4] sm:$0x3] }
  0x53   :  { %393 = vmatprep.subr.bf16.mxu1 %v744_v28  ;;  %v204_v28 = vrot.slane %v199_v27, %v65_v40 }
  0x56   :  { %394 = vmatpush1.bf16.msra.mxu1 %v746_v29  ;;  %v208_v29 = vrot.slane %v199_v27, %v69_v42 }
  0x57   :  { %395 = vmatprep.subr.bf16.mxu1 %v747_v30 }
  0x5a   :  { %396 = vmatpush1.bf16.msra.mxu1 %v749_v31 }
  0x5b   :  { %397 = vmatprep.subr.bf16.mxu1 %v750_v32 }
  0x5e   :  { %398 = vmatpush1.bf16.msra.mxu1 %v752_v33 }
  0x5f   :  { %399 = vmatprep.subr.bf16.mxu1 %v753_v34 }
  0x62   :  { %400 = vmatpush1.bf16.msra.mxu1 %v755_v35 }
  0x63   :  { %401 = vmatprep.subr.bf16.mxu1 %v756_v36 }
  0x66   :  { %402 = vmatpush1.bf16.msra.mxu1 %v758_v37 }
 0x102   :  { %v136_v45 = vpop.f32.mrb[0].mxu0 }
 0x103   :  { %v137_v46 = vadd.f32 %v136_v45, %v66_v43  ;;  %v138_v47 = vpop.f32.mrb[1].mxu0 }
 0x104   :  { %v139_v48 = vadd.f32 %v138_v47, %v70_v44  ;;  %v140_v49 = vpop.f32.mrb[2].mxu0 }
 0x105   :  { %v145_v50 = vsub.f32 0.0, %v137_v46  ;;  %v141_v51 = vadd.f32 %v140_v49, %v66_v43  ;;  %v142_v52 = vpop.f32.mrb[3].mxu0 }
 0x106   :  { %v146_v53 = vsub.f32 0.0, %v139_v48  ;;  %v143_v54 = vadd.f32 %v142_v52, %v70_v44 }
 0x107   :  { %v149_v55 = vmul.f32 1.442695, %v145_v50  ;;  %v147_v56 = vsub.f32 0.0, %v141_v51 }
 0x108   :  { %v151_v57 = vmul.f32 1.442695, %v146_v53  ;;  %v148_v58 = vsub.f32 0.0, %v143_v54 }
 0x109   :  { %775 = vpow2.f32 %v149_v55  ;;  %v153_v59 = vmul.f32 1.442695, %v147_v56 }
 0x10a   :  { %777 = vpow2.f32 %v151_v57  ;;  %v155_v60 = vmul.f32 1.442695, %v148_v58 }
 0x10b   :  { %779 = vpow2.f32 %v153_v59 }
 0x10c   :  { %781 = vpow2.f32 %v155_v60 }
 0x113   :  { %v776_v61 = vpop.eup %775 }
 0x114   :  { %v778_v62 = vpop.eup %777  ;;  %v157_v63 = vadd.f32 1.0, %v776_v61  ;;  %v658_v61 = vld [vmem:[%s974_s6] ss:$0 sm:$0xff] }
 0x115   :  { %v780_v0 = vpop.eup %779  ;;  %v158_v1 = vadd.f32 1.0, %v778_v62 }
 0x116   :  { %v782_v2 = vpop.eup %781  ;;  %783 = vrcp.f32 %v157_v63  ;;  %v159_v3 = vadd.f32 1.0, %v780_v0 }
 0x117   :  { %785 = vrcp.f32 %v158_v1  ;;  %v160_v4 = vadd.f32 1.0, %v782_v2 }
 0x118   :  { %787 = vrcp.f32 %v159_v3 }
 0x119   :  { %789 = vrcp.f32 %v160_v4 }
 0x120   :  { %v784_v5 = vpop.eup %783 }
 0x121   :  { %v786_v6 = vpop.eup %785 }
 0x122   :  { %v788_v7 = vpop.eup %787 }
 0x123   :  { %v790_v8 = vpop.eup %789  ;;  %v165_v9 = vpack.c.bf16 %v788_v7, %v784_v5 }
 0x124   :  { %v166_v10 = vpack.c.bf16 %v790_v8, %v786_v6 }
 0x126   :  { %403 = vmatprep.mubr.bf16.mxu1 %v166_v10 }
 0x127   :  { %404 = vmatmul.mubr.bf16.vlgmr.msra.gmra.mrb[0].mxu1 %v165_v9 }
 0x1fa   :  { %v405_v30 = vpop.f32.mrb[0].mxu1 }
 0x1fb   :  { %v406_v31 = vadd.f32 %v405_v30, %v204_v28  ;;  %v407_v32 = vpop.f32.mrb[1].mxu1 }
 0x1fc   :  { %v408_v33 = vadd.f32 %v407_v32, %v208_v29  ;;  %v409_v34 = vpop.f32.mrb[2].mxu1 }
 0x1fd   :  { %v414_v35 = vsub.f32 0.0, %v406_v31  ;;  %v410_v36 = vadd.f32 %v409_v34, %v204_v28  ;;  %v411_v37 = vpop.f32.mrb[3].mxu1 }
 0x1fe   :  { %v415_v38 = vsub.f32 0.0, %v408_v33  ;;  %v412_v41 = vadd.f32 %v411_v37, %v208_v29 }
 0x1ff   :  { %v418_v43 = vmul.f32 1.442695, %v414_v35  ;;  %v416_v44 = vsub.f32 0.0, %v410_v36 }
 0x200   :  { %v420_v45 = vmul.f32 1.442695, %v415_v38  ;;  %v417_v46 = vsub.f32 0.0, %v412_v41 }
 0x201   :  { %791 = vpow2.f32 %v418_v43  ;;  %v422_v47 = vmul.f32 1.442695, %v416_v44 }
 0x202   :  { %793 = vpow2.f32 %v420_v45  ;;  %v424_v40 = vmul.f32 1.442695, %v417_v46 }
 0x203   :  { %795 = vpow2.f32 %v422_v47 }
 0x204   :  { %797 = vpow2.f32 %v424_v40 }
 0x20b   :  { %v792_v39 = vpop.eup %791 }
 0x20c   :  { %v794_v42 = vpop.eup %793  ;;  %v426_v48 = vadd.f32 1.0, %v792_v39 }
 0x20d   :  { %v796_v49 = vpop.eup %795  ;;  %v427_v50 = vadd.f32 1.0, %v794_v42 }
 0x20e   :  { %v798_v51 = vpop.eup %797  ;;  %799 = vrcp.f32 %v426_v48  ;;  %v428_v52 = vadd.f32 1.0, %v796_v49 }
 0x20f   :  { %801 = vrcp.f32 %v427_v50  ;;  %v429_v53 = vadd.f32 1.0, %v798_v51 }
 0x210   :  { %803 = vrcp.f32 %v428_v52 }
 0x211   :  { %805 = vrcp.f32 %v429_v53 }
 0x218   :  { %v800_v54 = vpop.eup %799 }
 0x219   :  { %v802_v55 = vpop.eup %801 }
 0x21a   :  { %v804_v56 = vpop.eup %803 }
 0x21b   :  { %v806_v57 = vpop.eup %805  ;;  %v434_v58 = vpack.c.bf16 %v804_v56, %v800_v54 }
 0x21c   :  { %v435_v59 = vpack.c.bf16 %v806_v57, %v802_v55 }
 0x21e   :  { %603 = vmatprep.mubr.bf16.mxu0 %v435_v59 }
 0x21f   :  { %604 = vmatmul.mubr.bf16.vlgmr.msra.gmra.mrb[4].mxu0 %v434_v58 }
 0x2f2   :  { %v691_v60 = vpop.f32.mrb[4].mxu0 }
 0x2f3   :  { %v692_v62 = vpop.f32.mrb[5].mxu0 }
 0x2f4   :  { %v693_v63 = vadd.f32 %v692_v62, %v691_v60  ;;  %v694_v0 = vpop.f32.mrb[6].mxu0 }
 0x2f5   :  { %v695_v1 = vpop.f32.mrb[7].mxu0 }
 0x2f6   :  { %v606_v2 = vadd.f32 %v693_v63, %v658_v61  ;;  %v696_v3 = vadd.f32 %v695_v1, %v694_v0 }
 0x2f8   :  { %612 = vst [vmem:[%s975_s7] sm:$0xff] %v606_v2  ;;  %v609_v4 = vadd.f32 %v696_v3, %v658_v61 }
 0x2fa   :  { %613 = vst [vmem:[%s975_s7 + $0x8] sm:$0xff] %v609_v4 }
 0x2fb   :  { %618 = vsyncpa [#allocation3], 1 }
 0x2fc   :  { %619 = vsyncpa [#allocation5], 1 }

</bundles_post_ra>
